<compile_context>
chip_gen: v7x
topology: tpu7x:2x2x1
jax: 0.10.0
libtpu: 0.0.40
codegen_flags: <defaults>
</compile_context>

<pallas_src>
import functools

import jax
import jax.numpy as jnp
from jax.experimental import pallas as pl
from jax.experimental.pallas import tpu as pltpu


def _largest_divisor_leq(n: int, cap: int) -> int:
    cap = max(1, min(n, cap))
    for d in range(cap, 0, -1):
        if n % d == 0:
            return d
    return 1


def se_block_kernel(x_ref, w1_ref, b1_ref, w2_ref, b2_ref, o_ref, acc_ref, *,
                    hw: int, t_hw: int):
    # x_ref : (tn, C, t_hw)  native dtype        acc_ref: (tn, C) f32 scratch
    # w1_ref: (C, Cr)  (already scaled by 1/HW)  b1_ref : (1, Cr)
    # w2_ref: (Cr, C)                            b2_ref : (1, C)
    # o_ref : (tn, C)   (size-1 middle dim of the (N,1,C) output is squeezed)
    k = pl.program_id(1)
    nk = pl.num_programs(1)

    @pl.when(k == 0)
    def _init():
        acc_ref[...] = jnp.zeros_like(acc_ref)

    tail = hw % t_hw  # static: length of ragged last spatial chunk (0 == none)
    if tail == 0:
        # Every chunk is full -> plain accumulate, no mask work on the hot path.
        acc_ref[...] += jnp.sum(x_ref[...], axis=-1, dtype=jnp.float32)
    else:
        # Pallas clamps the DMA of the ragged last block, but VMEM contents past
        # HW are unspecified -> mask them to zero before accumulating.
        @pl.when(k != nk - 1)
        def _full_chunk():
            acc_ref[...] += jnp.sum(x_ref[...], axis=-1, dtype=jnp.float32)

        @pl.when(k == nk - 1)
        def _tail_chunk():
            lane = jax.lax.broadcasted_iota(jnp.int32, x_ref.shape, x_ref.ndim - 1)
            xm = jnp.where(lane < tail, x_ref[...], 0)
            acc_ref[...] += jnp.sum(xm, axis=-1, dtype=jnp.float32)

    @pl.when(k == nk - 1)
    def _finalize():
        s = acc_ref[...]                                     # (tn, C) pooled SUM, f32
        # compress: 1x1 conv == matmul (1/HW already folded into w1), then ReLU
        h = jnp.dot(s, w1_ref[...], preferred_element_type=jnp.float32)
        h = jnp.maximum(h + b1_ref[...], 0.0)                # (tn, Cr)
        # excitation: 1x1 conv == matmul, then sigmoid
        g = jnp.dot(h, w2_ref[...], preferred_element_type=jnp.float32)
        g = g + b2_ref[...]                                  # (tn, C)
        o_ref[...] = jax.nn.sigmoid(g).astype(o_ref.dtype)


def se_block(x_nchw, w1, b1, w2, b2, *,
             per_buffer_bytes=8 * 1024 * 1024,
             vmem_limit_bytes=48 * 1024 * 1024):
    """x_nchw: (N, C, H, W). w1: (Cr, C), b1: (Cr,), w2: (C, Cr), b2: (C,)
    (PyTorch Conv2d 1x1 weights with the trailing (1,1) squeezed).
    Returns sigmoid(excitation(relu(compress(avgpool(x))))) of shape (N, C, 1, 1)."""
    N, C, H, W = x_nchw.shape
    Cr = w1.shape[0]
    HW = H * W
    dtype = x_nchw.dtype
    dtype_bytes = jnp.dtype(dtype).itemsize

    row_bytes = C * HW * dtype_bytes          # one sample's full spatial slab

    if row_bytes <= per_buffer_bytes:
        # Whole (C, HW) sample(s) per block: no spatial tiling, no tail masking.
        cap = per_buffer_bytes // row_bytes
        if N >= 2:
            cap = min(cap, N // 2)  # v7x: keep >= 2 blocks on the "parallel" batch axis
        tn = _largest_divisor_leq(N, cap)
        t_hw = HW
    else:
        # A single sample exceeds the byte target: tile the spatial axis in
        # 128-lane multiples; the kernel masks the ragged tail chunk.
        tn = 1
        t_hw = max(128, (per_buffer_bytes // (C * dtype_bytes)) // 128 * 128)
        if t_hw >= HW:
            t_hw = HW
    # TODO(synk): for N == 1 on v7x, split the spatial reduction across a leading
    # size-2 "parallel" axis so both TensorCores are engaged (not needed here).
    # NOTE: for bf16/int8 inputs with tiny C, flattening (N, C) into one row axis
    # would avoid sublane padding of the C dim; f32 path here needs no change.

    x = x_nchw.reshape(N, C, HW)              # metadata-only reshape, no HBM copy

    # Pre-transpose weights; fold the 1/(H*W) average into w1 (matmul is linear).
    w1_t = jnp.asarray(w1, jnp.float32).T / float(HW)       # (C, Cr)
    w2_t = jnp.asarray(w2, jnp.float32).T                   # (Cr, C)
    b1_r = jnp.asarray(b1, jnp.float32).reshape(1, Cr)
    b2_r = jnp.asarray(b2, jnp.float32).reshape(1, C)

    grid = (N // tn, pl.cdiv(HW, t_hw))

    cost = pl.CostEstimate(
        flops=N * C * HW + 2 * N * (C * Cr + Cr * C),
        transcendentals=N * C,
        bytes_accessed=N * C * HW * dtype_bytes
                       + (C * Cr + Cr * C + Cr + C) * 4
                       + N * C * dtype_bytes,
    )

    kernel = functools.partial(se_block_kernel, hw=HW, t_hw=t_hw)

    out = pl.pallas_call(
        kernel,
        out_shape=jax.ShapeDtypeStruct((N, 1, C), dtype),
        grid_spec=pltpu.PrefetchScalarGridSpec(
            num_scalar_prefetch=0,
            grid=grid,
            in_specs=[
                pl.BlockSpec((tn, C, t_hw), lambda i, k: (i, 0, k)),
                # parameters: constant index_map -> stay VMEM-resident all steps
                pl.BlockSpec((C, Cr), lambda i, k: (0, 0)),
                pl.BlockSpec((1, Cr), lambda i, k: (0, 0)),
                pl.BlockSpec((Cr, C), lambda i, k: (0, 0)),
                pl.BlockSpec((1, C), lambda i, k: (0, 0)),
            ],
            out_specs=pl.BlockSpec((tn, None, C), lambda i, k: (i, 0, 0)),
            scratch_shapes=[pltpu.VMEM((tn, C), jnp.float32)],
        ),
        compiler_params=pltpu.CompilerParams(
            dimension_semantics=("parallel", "arbitrary"),
            vmem_limit_bytes=vmem_limit_bytes),
        cost_estimate=cost,
    )(x, w1_t, b1_r, w2_t, b2_r)
    return out.reshape(N, C, 1, 1)


def _reference(x_nchw, w1, b1, w2, b2):
    s = jnp.mean(x_nchw.astype(jnp.float32), axis=(2, 3))    # (N, C)
    h = jnp.maximum(s @ w1.T + b1, 0.0)                      # (N, Cr)
    g = jax.nn.sigmoid(h @ w2.T + b2)                        # (N, C)
    return g.reshape(*g.shape, 1, 1)


if __name__ == "__main__":
    key = jax.random.PRNGKey(0)
    k_x, k_w1, k_b1, k_w2, k_b2 = jax.random.split(key, 5)

    # SE_block(in_channel=8, ratio=2)  ->  compress: 8->4, excitation: 4->8
    N, C, H, W = 2, 8, 16, 16
    ratio = 2
    Cr = C // ratio

    x = jax.random.normal(k_x, (N, C, H, W), jnp.float32)
    # PyTorch Conv2d 1x1 weight shapes with trailing (1,1) squeezed:
    #   compress.weight (Cr, C), excitation.weight (C, Cr)
    w1 = 0.3 * jax.random.normal(k_w1, (Cr, C), jnp.float32)
    b1 = 0.1 * jax.random.normal(k_b1, (Cr,), jnp.float32)
    w2 = 0.3 * jax.random.normal(k_w2, (C, Cr), jnp.float32)
    b2 = 0.1 * jax.random.normal(k_b2, (C,), jnp.float32)

    out = se_block(x, w1, b1, w2, b2)
    jax.block_until_ready(out)

    ref = _reference(x, w1, b1, w2, b2)
    assert out.shape == (N, C, 1, 1)
    assert jnp.allclose(out, ref, atol=1e-5, rtol=1e-5), "mismatch vs reference"
    print("KERNEL_OK")
</pallas_src>

<mosaic_0001>
module attributes {stable_mosaic.version = 11 : i64} {
  func.func @se_block_kernel(%arg0: i32, %arg1: i32, %arg2: memref<1x8x256xf32, #tpu.memory_space<vmem>>, %arg3: memref<8x4xf32, #tpu.memory_space<vmem>>, %arg4: memref<1x4xf32, #tpu.memory_space<vmem>>, %arg5: memref<4x8xf32, #tpu.memory_space<vmem>>, %arg6: memref<1x8xf32, #tpu.memory_space<vmem>>, %arg7: memref<1x1x8xf32, #tpu.memory_space<vmem>>, %arg8: memref<1x8xf32, #tpu.memory_space<vmem>>) attributes {dimension_semantics = [#tpu.dimension_semantics<parallel>, #tpu.dimension_semantics<arbitrary>], iteration_bounds = array<i64: 2, 1>, scalar_prefetch = 0 : i64, scratch_operands = 1 : i64, tpu.core_type = #tpu.core_type<tc>, window_params = [{transform_indices = @transform_0, window_bounds = array<i64: 1, 8, 256>}, {pipeline_mode = #tpu.pipeline_mode<synchronous>, transform_indices = @transform_1, window_bounds = array<i64: 8, 4>}, {pipeline_mode = #tpu.pipeline_mode<synchronous>, transform_indices = @transform_2, window_bounds = array<i64: 1, 4>}, {pipeline_mode = #tpu.pipeline_mode<synchronous>, transform_indices = @transform_3, window_bounds = array<i64: 4, 8>}, {pipeline_mode = #tpu.pipeline_mode<synchronous>, transform_indices = @transform_4, window_bounds = array<i64: 1, 8>}, {transform_indices = @transform_5, window_bounds = array<i64: 1, 1, 8>}]} {
    %c0_i32 = arith.constant 0 : i32
    %0 = arith.cmpi eq, %arg1, %c0_i32 : i32
    %1 = arith.extui %0 : i1 to i32
    %c0_i32_0 = arith.constant 0 : i32
    %2 = arith.cmpi ne, %1, %c0_i32_0 : i32
    scf.if %2 {
      %cst_9 = arith.constant 0.000000e+00 : f32
      %11 = vector.broadcast %cst_9 : f32 to vector<1x8xf32>
      %c0_10 = arith.constant 0 : index
      %c0_11 = arith.constant 0 : index
      %12 = vector.load %arg8[%c0_10, %c0_11] : memref<1x8xf32, #tpu.memory_space<vmem>>, vector<1x8xf32>
      tpu.vector_store %arg8[%c0_10, %c0_11], %11 {strides = array<i32>} : memref<1x8xf32, #tpu.memory_space<vmem>>, vector<1x8xf32>,
    } else {
    }
    %c0 = arith.constant 0 : index
    %c0_1 = arith.constant 0 : index
    %3 = vector.load %arg8[%c0, %c0_1] : memref<1x8xf32, #tpu.memory_space<vmem>>, vector<1x8xf32>
    %c0_2 = arith.constant 0 : index
    %c0_3 = arith.constant 0 : index
    %c0_4 = arith.constant 0 : index
    %4 = vector.load %arg2[%c0_2, %c0_3, %c0_4] : memref<1x8x256xf32, #tpu.memory_space<vmem>>, vector<1x8x256xf32>
    %cst = arith.constant dense<0.000000e+00> : vector<1x8xf32>
    %5 = vector.multi_reduction <add>, %4, %cst [2] : vector<1x8x256xf32> to vector<1x8xf32>
    %6 = arith.addf %3, %5 : vector<1x8xf32>
    %c0_5 = arith.constant 0 : index
    %c0_6 = arith.constant 0 : index
    %7 = vector.load %arg8[%c0_5, %c0_6] : memref<1x8xf32, #tpu.memory_space<vmem>>, vector<1x8xf32>
    tpu.vector_store %arg8[%c0_5, %c0_6], %6 {strides = array<i32>} : memref<1x8xf32, #tpu.memory_space<vmem>>, vector<1x8xf32>,
    %c0_i32_7 = arith.constant 0 : i32
    %8 = arith.cmpi eq, %arg1, %c0_i32_7 : i32
    %9 = arith.extui %8 : i1 to i32
    %c0_i32_8 = arith.constant 0 : i32
    %10 = arith.cmpi ne, %9, %c0_i32_8 : i32
    scf.if %10 {
      %c0_9 = arith.constant 0 : index
      %c0_10 = arith.constant 0 : index
      %11 = vector.load %arg8[%c0_9, %c0_10] : memref<1x8xf32, #tpu.memory_space<vmem>>, vector<1x8xf32>
      %c0_11 = arith.constant 0 : index
      %c0_12 = arith.constant 0 : index
      %12 = vector.load %arg3[%c0_11, %c0_12] : memref<8x4xf32, #tpu.memory_space<vmem>>, vector<8x4xf32>
      %cst_13 = arith.constant dense<0.000000e+00> : vector<1x4xf32>
      %13 = tpu.matmul %11, %12, %cst_13 {dimension_numbers = #tpu.dot_dimension_numbers<[1], [0], [0], [1], [0, 0, 1, 1], [], []>} : vector<1x8xf32>, vector<8x4xf32>, vector<1x4xf32> -> vector<1x4xf32>
      %c0_14 = arith.constant 0 : index
      %c0_15 = arith.constant 0 : index
      %14 = vector.load %arg4[%c0_14, %c0_15] : memref<1x4xf32, #tpu.memory_space<vmem>>, vector<1x4xf32>
      %15 = arith.addf %13, %14 : vector<1x4xf32>
      %cst_16 = arith.constant 0.000000e+00 : f32
      %16 = vector.broadcast %cst_16 : f32 to vector<1x4xf32>
      %17 = arith.maximumf %15, %16 : vector<1x4xf32>
      %c0_17 = arith.constant 0 : index
      %c0_18 = arith.constant 0 : index
      %18 = vector.load %arg5[%c0_17, %c0_18] : memref<4x8xf32, #tpu.memory_space<vmem>>, vector<4x8xf32>
      %cst_19 = arith.constant dense<0.000000e+00> : vector<1x8xf32>
      %19 = tpu.matmul %17, %18, %cst_19 {dimension_numbers = #tpu.dot_dimension_numbers<[1], [0], [0], [1], [0, 0, 1, 1], [], []>} : vector<1x4xf32>, vector<4x8xf32>, vector<1x8xf32> -> vector<1x8xf32>
      %c0_20 = arith.constant 0 : index
      %c0_21 = arith.constant 0 : index
      %20 = vector.load %arg6[%c0_20, %c0_21] : memref<1x8xf32, #tpu.memory_space<vmem>>, vector<1x8xf32>
      %21 = arith.addf %19, %20 : vector<1x8xf32>
      %22 = arith.negf %21 : vector<1x8xf32>
      %23 = math.exp %22 : vector<1x8xf32>
      %cst_22 = arith.constant 1.000000e+00 : f32
      %24 = vector.broadcast %cst_22 : f32 to vector<1x8xf32>
      %25 = arith.addf %24, %23 : vector<1x8xf32>
      %26 = arith.divf %24, %25 : vector<1x8xf32>
      %c0_23 = arith.constant 0 : index
      %c0_24 = arith.constant 0 : index
      %c0_25 = arith.constant 0 : index
      %27 = vector.load %arg7[%c0_23, %c0_24, %c0_25] : memref<1x1x8xf32, #tpu.memory_space<vmem>>, vector<1x1x8xf32>
      %28 = vector.shape_cast %27 : vector<1x1x8xf32> to vector<1x8xf32>
      %29 = vector.shape_cast %26 : vector<1x8xf32> to vector<1x1x8xf32>
      tpu.vector_store %arg7[%c0_23, %c0_24, %c0_25], %29 {strides = array<i32>} : memref<1x1x8xf32, #tpu.memory_space<vmem>>, vector<1x1x8xf32>,
    } else {
    }
    return
  }
  func.func @transform_0(%arg0: i32, %arg1: i32) -> (i32, i32, i32) {
    %c0_i32 = arith.constant 0 : i32
    %c0_i32_0 = arith.constant 0 : i32
    return %arg0, %c0_i32, %arg1 : i32, i32, i32
  }
  func.func @transform_1(%arg0: i32, %arg1: i32) -> (i32, i32) {
    %c0_i32 = arith.constant 0 : i32
    %c0_i32_0 = arith.constant 0 : i32
    %c0_i32_1 = arith.constant 0 : i32
    return %c0_i32, %c0_i32_0 : i32, i32
  }
  func.func @transform_2(%arg0: i32, %arg1: i32) -> (i32, i32) {
    %c0_i32 = arith.constant 0 : i32
    %c0_i32_0 = arith.constant 0 : i32
    %c0_i32_1 = arith.constant 0 : i32
    return %c0_i32, %c0_i32_0 : i32, i32
  }
  func.func @transform_3(%arg0: i32, %arg1: i32) -> (i32, i32) {
    %c0_i32 = arith.constant 0 : i32
    %c0_i32_0 = arith.constant 0 : i32
    %c0_i32_1 = arith.constant 0 : i32
    return %c0_i32, %c0_i32_0 : i32, i32
  }
  func.func @transform_4(%arg0: i32, %arg1: i32) -> (i32, i32) {
    %c0_i32 = arith.constant 0 : i32
    %c0_i32_0 = arith.constant 0 : i32
    %c0_i32_1 = arith.constant 0 : i32
    return %c0_i32, %c0_i32_0 : i32, i32
  }
  func.func @transform_5(%arg0: i32, %arg1: i32) -> (i32, i32, i32) {
    %c0_i32 = arith.constant 0 : i32
    %c0_i32_0 = arith.constant 0 : i32
    %c0_i32_1 = arith.constant 0 : i32
    return %arg0, %c0_i32, %c0_i32_0 : i32, i32, i32
  }
}

</mosaic_0001>

<bundles_post_ra>
// kernel: tpu_custom_call.1
= control target key start
LH: loop header
LB: loop body
LE: loop exit
PB: predicated region body
PF: predicated region fallthrough
CT: control target
= control target key end

     0   :  { %10 = vsyncpa [#allocation4], 0  ;;  %s1076_s0 = inlined_call_operand.hbm [shape: f32[2,8,256], index: 0, kind: input, shape index: {}]   ;;  %s1077_s1 = inlined_call_operand.vmem [shape: f32[8,4], index: 1, kind: input, shape index: {}]   ;;  %s1078_s2 = inlined_call_operand.vmem [shape: f32[1,4], index: 2, kind: input, shape index: {}]   ;;  %s1079_s3 = inlined_call_operand.vmem [shape: f32[4,8], index: 3, kind: input, shape index: {}]   ;;  %s1080_s4 = inlined_call_operand.vmem [shape: f32[1,8], index: 4, kind: input, shape index: {}]   ;;  %s1081_s5 = inlined_call_operand.hbm [shape: f32[2,1,8], index: 5, kind: output, shape index: {}]  }
   0x1   :  { %12 = vsyncpa [#allocation4 + $0x1], 0 }
   0x2   :  { %13 = vsyncpa [#allocation5], 0 }
   0x3   :  { %15 = vsyncpa [#allocation5 + $0x1], 0  ;;  %s888_s18 = smov 0   ;;  %s890_s19 = smov 0  }
   0x4   :  { %s892_s20 = smov 0   ;;  %s894_s21 = smov 0  }
   0x5   :  { %s896_s22 = smov 0   ;;  %s898_s23 = smov 0  }
   0x6 LB: > { %s636_s24 = sadd.s32 4294967295, %s850_s23   ;;  %s637_s25 = sadd.s32 4294967294, %s850_s23   ;;  %s850_s23 = sphi %s898_s23, %s21_s23   ;;  %s846_s22 = sphi %s896_s22, %s1097_s22   ;;  %s842_s21 = sphi %s894_s21, %s1096_s21   ;;  %s838_s20 = sphi %s892_s20, %s1095_s20   ;;  %s834_s19 = sphi %s890_s19, %s1094_s19   ;;  %s830_s18 = sphi %s888_s18, %s1093_s18  }
   0x7   : > { %s33_s26 = sadd.s32 1, %s846_s22  ;;  %s42_s27 = sadd.s32 1, %s838_s20 }
   0x8   : > { %p35_p0 = scmp.ge.s32.totalorder %s33_s26, 2  ;;  %p49_p1 = scmp.ne.s32.totalorder %s838_s20, %s834_s19 }
   0x9   : > { %p50_p2 = scmp.eq.s32.totalorder %s850_s23, 0  ;;  %p55_p3 = scmp.ne.s32.totalorder %s834_s19, %s830_s18 }
   0xa   : > { %s1099_s26 = smov (%p35_p0, %s33_s26), 0  ;;  %p56_p5 = scmp.eq.s32.totalorder %s636_s24, 0 }
   0xb   : > { %p929_p4 = por %p50_p2, %p49_p1  ;;  %s37_s29 = ssub.s32 %s846_s22, %s1099_s26 }
   0xc   : > { %p163_p6 = scmp.eq.s32.totalorder %s636_s24, 1  ;;  %p40_p7 = scmp.eq.s32.totalorder %s37_s29, 0 }
   0xd   : > { %p935_p8 = por %p56_p5, %p55_p3  ;;  %p169_p10 = scmp.eq.s32.totalorder %s637_s25, 1 }
   0xe   : > { %p939_p9 = por %p163_p6, %p49_p1  ;;  %p679_p13 = scmp.lt.s32.totalorder %s850_s23, 2 }
   0xf   : > { %s944_s7 = scalar_select %p40_p7, %s838_s20, %s42_s27  }
  0x10   : > { %s1085_s6 = scalar_select %p939_p9, 1, 0 }
  0x11   : > { %p946_p11 = por %p169_p10, %p55_p3  ;;  %s201_s9 = sand.u32 1, %s838_s20  }
  0x12   : > { %s640_s10 = sshll.u32 %s201_s9, 4  ;;  %s652_s11 = sshll.u32 %s846_s22, 8 }
  0x13   : > { %s1086_s8 = scalar_select %p946_p11, 1, 0 }
  0x14   : > { %s957_s14 = scalar_lea.hbm %s1076_s0, %s652_s11  ;;  %s205_s15 = scalar_lea.vmem [#allocation3], %s640_s10 }
  0x15   : > { %s215_s16 = sshll.u32 %s205_s15, 4  ;;  %p963_p0 = pnand %p679_p13, %p929_p4  ;;  %s959_s16 = int_to_ptr.vmem [resolvable:$true] %s215_s16 }
  0x16   : > { %s202_s24 = scalar_lea.sflag [#allocation4], %s201_s9  ;;  %s738_s25 = scalar_lea.hbm %s957_s14, 256 }
  0x17   : > { %p739_p3 = scmp.ne.s32.totalorder %s957_s14, %s738_s25  ;;  %p740_p5 = pneg %p963_p0 }
  0x18   : > { %s743_s28 = scalar_lea.hbm %s1076_s0, 512  ;;  %p744_p4 = scmp.lt.u32.totalorder %s957_s14, %s1076_s0 }
  0x19   : > { %p741_p6 = pnand %p740_p5, %p739_p3  ;;  %p745_p10 = scmp.lt.u32.totalorder %s743_s28, %s738_s25 }
  0x1a   : > { %p747_p12 = scmp.lt.u32.totalorder %s738_s25, %s957_s14 }
  0x1b   : > { %p742_p7 = pneg %p741_p6  ;;  %p746_p13 = por %p745_p10, %p744_p4 }
  0x1d   : > { %p748_p1 = por %p747_p12, %p746_p13 }
  0x1f   : > { %p749_p2 = pnand %p748_p1, %p742_p7 }
  0x21   : > { %752 = shalt.err (!%p749_p2)
}
  0x22   : > { %s753_s9 = scalar_lea.vmem %s959_s16, 256  ;;  %s852_s12 = smov [#allocation3]  }
  0x23   : > { %p754_p3 = scmp.ne.s32.totalorder %s959_s16, %s753_s9  ;;  %s758_s13 = sshll.u32 %s852_s12, 4  ;;  %s759_s13 = int_to_ptr.vmem [resolvable:$false] %s758_s13 }
  0x24   : > { %s760_s15 = scalar_lea.vmem %s759_s13, 512  ;;  %p761_p9 = scmp.lt.s32.totalorder %s959_s16, %s759_s13 }
  0x25   : > { %p756_p6 = pnand %p754_p3, %p740_p5  ;;  %p762_p4 = scmp.lt.s32.totalorder %s760_s15, %s753_s9 }
  0x27   : > { %p757_p11 = pneg %p756_p6  ;;  %p763_p10 = por %p762_p4, %p761_p9 }
  0x29   : > { %p764_p12 = pnand %p763_p10, %p757_p11 }
  0x2b   : > { %767 = shalt.err (!%p764_p12)
}
  0x2c   : > { %674 = dma.hbm_to_vmem [thread:$0]  (!%p963_p0), %s957_s14, 256, %s959_s16, %s202_s24  }
  0x2d   : > { %p1088_p1 = scmp.lt.s32.totalorder %s850_s23, 3  ;;  %p1089_p2 = scmp.ge.s32.totalorder %s850_s23, 1 }
  0x2f   : > { %p221_p5 = pnand %p1089_p2, %p1088_p1 }
  0x30   : > { %s999_s25 = sand.u32 (!%p221_p5), 1, %s834_s19  }
  0x31   : > { %224 = sbr.rel (%p221_p5) target bundleno = 829 (0x33d), region = 40  ;;  %s644_s27 = sshll.u32 (!%p221_p5), %s999_s25, 4 }
  0x32   : > { %s227_s29 = scalar_lea.sflag (!%p221_p5), [#allocation4], %s999_s25  ;;  %s230_s28 = scalar_lea.vmem (!%p221_p5), [#allocation3], %s644_s27 }
  0x38   : > { %821 = dma.done.wait (%p935_p8), %s227_s29, 256  }
  0x39   : > { %823 = vsyncadd (%p935_p8), %s227_s29, 4294967040  ;;  %v264_v0 = vld [vmem:[%s230_s28] sm:$0xff]  ;;  %v265_v1 = vld [vmem:[%s230_s28 + $0x8] sm:$0xff]  ;;  %v853_v3 = vmov 0   ;;  %v270_v4 = vlaneseq  ;;  %v854_v8 = vmov 1966171168  }
  0x3a   : > { %v266_v2 = vadd.f32 %v265_v1, %v264_v0  ;;  %733 = vset.pattern.permute.xlu0 %v853_v3  ;;  %v307_v9 = vunpack.c.l.s4 %v854_v8  ;;  %vm261_vm0 = vcmask 57344   ;;  %v855_v42 = vmov 0.0   ;;  %v382_v43 = vld [vmem:[%s1077_s1] sm:$0xff]  ;;  %s649_s12 = sshll.u32 %s842_s21, 4  ;;  %s255_s13 = scalar_lea.vmem [#allocation6], %s999_s25 }
  0x3b   : > { %v271_v5 = vshrl.u32 %v270_v4, 7  ;;  %v355_v6 = vand.u32 127, %v270_v4  ;;  %262 = vst.msk [vmem:[#allocation2] sm:$0x1] %vm261_vm0, %v855_v42  ;;  %657 = vmatprep.subr.mxu0 %v855_v42  ;;  %662 = vmatprep.subr.mxu1 %v855_v42  ;;  %vm856_vm1 = vmmov 0   ;;  %vm384_vm2 = vcmask 64512   ;;  %s1026_s28 = scalar_lea.hbm %s1081_s5, %s649_s12 }
  0x3c   : > { %267 = vadd.xlane.f32.xlu0 %v266_v2  ;;  %v308_v10 = vunpack.c.0.s8 %v307_v9  ;;  %658 = vmatpush3.msra.mxu0 %v382_v43  ;;  %v459_v51 = vld [vmem:[%s1079_s3] sm:$0xf]  ;;  %vm465_vm3 = vcmask 1043456   ;;  %vm461_vm4 = vcmask 31744   ;;  %s559_s15 = sshll.u32 %s255_s13, 4  ;;  %s547_s30 = scalar_lea.sflag [#allocation5], %s999_s25  ;;  %s1028_s15 = int_to_ptr.vmem [resolvable:$true] %s559_s15 }
  0x3d   : > { %v358_v7 = vsub.s32 %v355_v6, %v271_v5  ;;  %v272_v11 = vsub.s32 0, %v271_v5  ;;  %v276_v12 = vsub.s32 1, %v271_v5  ;;  %v280_v13 = vsub.s32 2, %v271_v5  ;;  %659 = vmatprep.mubr.msk.f32.mxu0 %vm856_vm1, %v855_v42  ;;  %664 = vmatprep.mubr.msk.f32.mxu1 %vm856_vm1, %v855_v42  ;;  %v383_v52 = vld [vmem:[%s1078_s2] sm:$0x1]  ;;  %s768_s14 = scalar_lea.vmem %s1028_s15, 16 }
  0x3e   : > { %v284_v14 = vsub.s32 3, %v271_v5  ;;  %v288_v15 = vsub.s32 4, %v271_v5  ;;  %v292_v16 = vsub.s32 5, %v271_v5  ;;  %v296_v17 = vsub.s32 6, %v271_v5  ;;  %663 = vmatpush3.msk.msra.mxu1 %vm465_vm3, %v459_v51  ;;  %v460_v57 = vld [vmem:[%s1080_s4] sm:$0x1]  ;;  %p769_p8 = scmp.ne.s32.totalorder %s1028_s15, %s768_s14 }
  0x3f   : > { %v300_v18 = vsub.s32 7, %v271_v5  ;;  %v311_v20 = vsub.s32 %v308_v10, %v271_v5  ;;  %p1090_p9 = scmp.ne.s32.totalorder %s1085_s6, 0  ;;  %s857_s21 = smov [#allocation6]  }
  0x40   : > { %s772_s16 = sshll.u32 %s857_s21, 4  ;;  %s773_s16 = int_to_ptr.vmem [resolvable:$false] %s772_s16 }
  0x41   : > { %p770_p11 = pnand %p769_p8, %p1090_p9  ;;  %s774_s17 = scalar_lea.vmem %s773_s16, 32 }
  0x42   : > { %v263_v47 = vld [vmem:[#allocation2] sm:$0x1]  ;;  %p775_p7 = scmp.lt.s32.totalorder %s1028_s15, %s773_s16  ;;  %p776_p13 = scmp.lt.s32.totalorder %s774_s17, %s768_s14 }
  0x43   : > { %p771_p0 = pneg %p770_p11 }
  0x44   : > { %p777_p3 = por %p776_p13, %p775_p7 }
  0x46   : > { %p778_p6 = pnand %p777_p3, %p771_p0 }
  0xc9   : > { %v268_v19 = vpop.xlane.xlu0 %267 }
  0xca   : > { %v273_v21 = vrot.slane %v268_v19, %v272_v11  ;;  %v277_v22 = vrot.slane %v268_v19, %v276_v12  ;;  %v281_v23 = vrot.slane %v268_v19, %v280_v13  ;;  %v285_v24 = vrot.slane %v268_v19, %v284_v14 }
  0xcb   : > { %v289_v25 = vrot.slane %v268_v19, %v288_v15  ;;  %v293_v26 = vrot.slane %v268_v19, %v292_v16  ;;  %v297_v27 = vrot.slane %v268_v19, %v296_v17  ;;  %v301_v28 = vrot.slane %v268_v19, %v300_v18 }
  0xcc   : > { %v302_v29 = vcombine.low %v273_v21, %v277_v22  ;;  %v303_v30 = vcombine.low %v281_v23, %v285_v24 }
  0xcd   : > { %v304_v31 = vcombine.low %v289_v25, %v293_v26  ;;  %v305_v32 = vcombine.low %v297_v27, %v301_v28 }
  0xce   : > { %v312_v33 = vrot.slane %v302_v29, %v311_v20  ;;  %v319_v34 = vrot.slane %v303_v30, %v311_v20 }
  0xcf   : > { %v326_v35 = vrot.slane %v304_v31, %v311_v20  ;;  %v333_v36 = vrot.slane %v305_v32, %v311_v20 }
  0xd0   : > { %v334_v37 = vcombine.low %v312_v33, %v319_v34 }
  0xd1   : > { %v335_v38 = vcombine.low %v326_v35, %v333_v36 }
  0xd2   : > { %v342_v39 = vrot.slane %v334_v37, %v311_v20 }
  0xd3   : > { %v349_v40 = vrot.slane %v335_v38, %v311_v20 }
  0xd5   : > { %v350_v41 = vcombine.low %v342_v39, %v349_v40 }
  0xd7   : > { %352 = vperm.xlu0 %733, %v350_v41  }
 0x156   : > { %v353_v44 = vpop.permute.xlu0 %352 }
 0x157   : > { %v359_v45 = vrot.slane %v353_v44, %v358_v7 }
 0x159   : > { %v366_v46 = vrot.slane %v359_v45, %v311_v20 }
 0x15b   : > { %v373_v48 = vrot.slane %v366_v46, %v311_v20 }
 0x15d   : > { %v375_v49 = vadd.f32 %v373_v48, %v263_v47 }
 0x15f   : > { %377 = vst.msk [vmem:[#allocation2] sm:$0x1] %vm261_vm0, %v375_v49 }
 0x166   : > { %v381_v50 = vld [vmem:[#allocation2] sm:$0x1] }
 0x167   : > { %660 = vmatmul.mubr.msk.f32.vlgmr.msra.gmra.mrb[0].mxu0 %vm384_vm2, %v381_v50 }
 0x23a   : > { %v454_v53 = vpop.f32.mrb[0].mxu0 }
 0x23b   : > { %v455_v54 = vadd.f32 %v454_v53, %v383_v52  ;;  %v661_v55 = vpop.f32.mrb[1].mxu0 }
 0x23d   : > { %v458_v56 = vmax.f32 %v455_v54, 0.0 }
 0x23f   : > { %665 = vmatmul.mubr.msk.f32.vlgmr.msra.gmra.mrb[0].mxu1 %vm461_vm4, %v458_v56 }
 0x312   : > { %v535_v58 = vpop.f32.mrb[0].mxu1 }
 0x313   : > { %v536_v59 = vadd.f32 %v535_v58, %v460_v57  ;;  %v666_v60 = vpop.f32.mrb[1].mxu1 }
 0x315   : > { %v648_v61 = vmul.f32 -1.442695, %v536_v59 }
 0x317   : > { %734 = vpow2.f32 %v648_v61 }
 0x321   : > { %v735_v62 = vpop.eup %734 }
 0x322   : > { %v542_v63 = vadd.f32 1.0, %v735_v62 }
 0x324   : > { %736 = vrcp.f32 %v542_v63 }
 0x32e   : > { %v737_v0 = vpop.eup %736 }
 0x32f   : > { %545 = vst.msk [vmem:[%s255_s13] sm:$0x1] %vm261_vm0, %v737_v0 }
 0x330   : > { %781 = shalt.err (!%p778_p6)
}
 0x331   : > { %s782_s25 = scalar_lea.hbm %s1026_s28, 16  ;;  %s786_s11 = scalar_lea.hbm %s1081_s5, 32 }
 0x332   : > { %p783_p4 = scmp.ne.s32.totalorder %s1026_s28, %s782_s25  ;;  %p787_p1 = scmp.lt.u32.totalorder %s1026_s28, %s1081_s5 }
 0x333   : > { %p788_p2 = scmp.lt.u32.totalorder %s786_s11, %s782_s25  ;;  %p790_p8 = scmp.lt.u32.totalorder %s782_s25, %s1026_s28 }
 0x334   : > { %p784_p10 = pnand %p783_p4, %p1090_p9 }
 0x335   : > { %p789_p5 = por %p788_p2, %p787_p1 }
 0x336   : > { %p785_p12 = pneg %p784_p10 }
 0x337   : > { %p791_p11 = por %p790_p8, %p789_p5 }
 0x339   : > { %p792_p0 = pnand %p791_p11, %p785_p12 }
 0x33b   : > { %795 = shalt.err (!%p792_p0)
}
 0x33c   : > { %669 = dma.vmem_to_hbm [thread:$0]  (%p1090_p9), %s1028_s15, 16, %s1026_s28, %s547_s30  }
 0x33d PF: > { %s571_s13 = sand.u32 1, %s830_s18   ;;  %p1091_p7 = scmp.ne.s32.totalorder %s1086_s8, 0 }
 0x33e   : > { %p1092_p13 = scmp.ge.s32.totalorder %s850_s23, 2  ;;  %s572_s27 = scalar_lea.sflag [#allocation5], %s571_s13 }
 0x340   : > { %p676_p3 = pnand %p1092_p13, %p1091_p7 }
 0x342   : > { %825 = dma.done.wait (!%p676_p3), %s572_s27, 16  }
 0x343   : > { %827 = vsyncadd (!%p676_p3), %s572_s27, 4294967280  ;;  %s21_s23 = sadd.s32 1, %s850_s23   ;;  %s1093_s18 = smov %s834_s19 }
 0x344   : > { %p18_p6 = scmp.ge.s32.totalorder %s21_s23, 4   ;;  %s1094_s19 = smov %s838_s20 }
 0x345   : > { %s1095_s20 = smov %s944_s7  ;;  %s1096_s21 = smov %s846_s22 }
 0x346   : > { %s1097_s22 = smov %s1099_s26  ;;  %20 = sbr.rel (!%p18_p6) target bundleno = 6 (0x6), region = 93 }
 0x34d   :  { %576 = vsyncpa [#allocation4], 1 }
 0x34e   :  { %578 = vsyncpa [#allocation4 + $0x1], 1 }
 0x34f   :  { %579 = vsyncpa [#allocation5], 1 }
 0x350   :  { %581 = vsyncpa [#allocation5 + $0x1], 1 }

</bundles_post_ra>
